<compile_context>
chip_gen: v7x
topology: tpu7x:2x2x1
jax: 0.10.0
libtpu: 0.0.40
codegen_flags: <defaults>
</compile_context>

<pallas_src>
import jax
import jax.numpy as jnp
import numpy as np
from jax.experimental import pallas as pl
from jax.experimental.pallas import tpu as pltpu

# ----------------------- model hyper-parameters (small) -----------------------
N_CLS   = 4                      # number of class names
N_CTX   = 24                     # fixed by the module (__init__: n_ctx = 24)
CTX_DIM = 64                     # clip_model.ln_final.weight.shape[0]
VIS_DIM = 64                     # clip_model.visual.output_dim
HID_DIM = VIS_DIM // 16          # meta_net hidden dim = 4
SEQ_LEN = 32                     # tokenized prompt length (CLIP uses 77; small here)
SUF_LEN = SEQ_LEN - 1 - N_CTX    # token_suffix length = 7
FLAT    = SEQ_LEN * CTX_DIM      # 2048 lane-dense flattened prompt per class
BATCH   = 2
N_TOK   = 8                      # number of image tokens pooled by mean(dim=1)
ROWS    = BATCH * N_CLS          # 8 output rows -> full-sublane slab


def prompt_learner_kernel(im_ref, pool_ref, w1t_ref, b1_ref, w2t_ref,
                          base_ref, out_ref):
    """Single grid step processes the whole batch.

    im_ref   : (B*N_TOK, VIS_DIM)    image token features, batch-flattened
    pool_ref : (B*N_CLS, B*N_TOK)    constant: mean-pool (1/N_TOK) + repeat
                                     each batch row over its N_CLS output rows
    w1t_ref  : (VIS_DIM, HID_DIM)    linear1 weight, pre-transposed
    b1_ref   : (1, HID_DIM)
    w2t_ref  : (HID_DIM, FLAT)       linear2 weight, pre-transposed, tiled over
                                     the N_CTX token slots, zero-padded over
                                     prefix/suffix slots
    base_ref : (B*N_CLS, FLAT)       [prefix | ctx | suffix] + padded b2,
                                     pre-tiled over the batch
    out_ref  : (B*N_CLS, FLAT)
    """
    # mean-pool over image tokens AND replicate per-batch rows over N_CLS:
    # pooled_rep[b*N_CLS + c, :] = mean_t im[b, t, :]
    pooled_rep = jnp.dot(pool_ref[...], im_ref[...],
                         preferred_element_type=jnp.float32)          # (ROWS, VIS_DIM)

    # meta_net: linear1 -> relu -> linear2 (bias b2 already folded into base)
    h = jnp.dot(pooled_rep, w1t_ref[...],
                preferred_element_type=jnp.float32) + b1_ref[...]     # (ROWS, HID_DIM)
    h = jnp.maximum(h, 0.0)                                           # ReLU
    bias_flat = jnp.dot(h, w2t_ref[...],
                        preferred_element_type=jnp.float32)           # (ROWS, FLAT)

    # prompts[b, c] = base[c] + b2_pad + bias[b]   (zero on prefix/suffix lanes)
    # -> one VPU add, one aligned unmasked full-block store.
    out_ref[...] = base_ref[...] + bias_flat


def prompt_learner_forward(im_features, w1, b1, w2, b2, ctx, prefix, suffix):
    """im_features: (B, N_TOK, VIS_DIM) -> prompts (B, N_CLS, SEQ_LEN, CTX_DIM)."""
    B = im_features.shape[0]
    rows = B * N_CLS

    # ---- parameter-only / shape-only layout plumbing (init-time constants) ----
    w1t = w1.T                                               # (VIS_DIM, HID_DIM)
    b1_2d = b1.reshape(1, HID_DIM)

    # linear2 weight tiled over the N_CTX token slots, zero-padded over
    # prefix/suffix slots, so h @ w2t_pad directly yields the bias laid out
    # over the flattened SEQ_LEN*CTX_DIM prompt lanes.
    w2t_pad = jnp.concatenate(
        [jnp.zeros((HID_DIM, CTX_DIM), jnp.float32),
         jnp.tile(w2.T, (1, N_CTX)),
         jnp.zeros((HID_DIM, SUF_LEN * CTX_DIM), jnp.float32)], axis=1)  # (HID, FLAT)
    b2_pad = jnp.concatenate(
        [jnp.zeros((CTX_DIM,), jnp.float32),
         jnp.tile(b2, N_CTX),
         jnp.zeros((SUF_LEN * CTX_DIM,), jnp.float32)])                  # (FLAT,)

    # batch-invariant base prompt [prefix | ctx | suffix], flattened lane-dense,
    # with the (padded) linear2 bias folded in, pre-tiled over the batch so the
    # kernel output is a full-sublane (rows, FLAT) slab.
    base = jnp.concatenate(
        [prefix, jnp.broadcast_to(ctx[None], (N_CLS, N_CTX, CTX_DIM)), suffix],
        axis=1)                                                          # (N_CLS, SEQ, D)
    base_flat = base.reshape(N_CLS, FLAT) + b2_pad[None, :]
    base_tiled = jnp.tile(base_flat, (B, 1))                             # (rows, FLAT)

    # pool-and-repeat constant: P[r, j] = 1/N_TOK if (j // N_TOK) == (r // N_CLS)
    row_b = jnp.arange(rows) // N_CLS
    col_b = jnp.arange(B * N_TOK) // N_TOK
    pool_mat = (row_b[:, None] == col_b[None, :]).astype(jnp.float32) / N_TOK

    # contiguous (free) reshape of the activation input
    im_flat = im_features.reshape(B * N_TOK, VIS_DIM)

    flops = (2 * rows * (B * N_TOK) * VIS_DIM          # pool + repeat
             + 2 * rows * VIS_DIM * HID_DIM            # linear1
             + 2 * rows * HID_DIM * FLAT               # linear2
             + rows * FLAT)                            # broadcast add
    bytes_accessed = 4 * (B * N_TOK * VIS_DIM + rows * B * N_TOK
                          + VIS_DIM * HID_DIM + HID_DIM
                          + HID_DIM * FLAT + rows * FLAT + rows * FLAT)

    out_flat = pl.pallas_call(
        prompt_learner_kernel,
        out_shape=jax.ShapeDtypeStruct((rows, FLAT), jnp.float32),
        grid_spec=pltpu.PrefetchScalarGridSpec(
            num_scalar_prefetch=0,
            grid=(1,),
            in_specs=[
                pl.BlockSpec((B * N_TOK, VIS_DIM), lambda g: (0, 0)),
                pl.BlockSpec((rows, B * N_TOK), lambda g: (0, 0)),
                pl.BlockSpec((VIS_DIM, HID_DIM), lambda g: (0, 0)),
                pl.BlockSpec((1, HID_DIM), lambda g: (0, 0)),
                pl.BlockSpec((HID_DIM, FLAT), lambda g: (0, 0)),
                pl.BlockSpec((rows, FLAT), lambda g: (0, 0)),
            ],
            out_specs=pl.BlockSpec((rows, FLAT), lambda g: (0, 0)),
        ),
        compiler_params=pltpu.CompilerParams(
            dimension_semantics=("arbitrary",)),
        cost_estimate=pl.CostEstimate(flops=flops, transcendentals=0,
                                      bytes_accessed=bytes_accessed),
    )(im_flat, pool_mat, w1t, b1_2d, w2t_pad, base_tiled)

    # Pure row-major reshape back to the PyTorch output layout.
    return out_flat.reshape(B, N_CLS, SEQ_LEN, CTX_DIM)


def prompt_learner_reference(im_features, w1, b1, w2, b2, ctx, prefix, suffix):
    """Plain-JAX reference mirroring the PyTorch forward."""
    pooled = im_features.mean(axis=1)                               # (B, VIS_DIM)
    h = jnp.maximum(pooled @ w1.T + b1, 0.0)                        # (B, HID_DIM)
    bias = h @ w2.T + b2                                            # (B, CTX_DIM)
    ctx_shifted = ctx[None, :, :] + bias[:, None, :]                # (B, N_CTX, D)
    ctx_b = jnp.broadcast_to(ctx_shifted[:, None, :, :],
                             (im_features.shape[0], N_CLS, N_CTX, CTX_DIM))
    pre = jnp.broadcast_to(prefix[None], (im_features.shape[0],) + prefix.shape)
    suf = jnp.broadcast_to(suffix[None], (im_features.shape[0],) + suffix.shape)
    return jnp.concatenate([pre, ctx_b, suf], axis=2)


if __name__ == "__main__":
    key = jax.random.PRNGKey(0)
    k_im, k_ctx, k_w1, k_b1, k_w2, k_b2, k_pre, k_suf = jax.random.split(key, 8)

    # deterministic "parameters" (shapes from __init__)
    ctx = 0.02 * jax.random.normal(k_ctx, (N_CTX, CTX_DIM), jnp.float32)
    w1 = 0.05 * jax.random.normal(k_w1, (HID_DIM, VIS_DIM), jnp.float32)   # linear1
    b1 = 0.01 * jax.random.normal(k_b1, (HID_DIM,), jnp.float32)
    w2 = 0.05 * jax.random.normal(k_w2, (CTX_DIM, HID_DIM), jnp.float32)   # linear2
    b2 = 0.01 * jax.random.normal(k_b2, (CTX_DIM,), jnp.float32)
    # token_prefix / token_suffix stand in for the frozen CLIP token embeddings
    # TODO(synk): CLIP tokenization + token_embedding (init-time buffer setup) has
    # no Pallas equivalent; the frozen buffers are passed in directly.
    prefix = jax.random.normal(k_pre, (N_CLS, 1, CTX_DIM), jnp.float32)
    suffix = jax.random.normal(k_suf, (N_CLS, SUF_LEN, CTX_DIM), jnp.float32)

    # example input: image token features (B, N_TOK, VIS_DIM)
    im_features = jax.random.normal(k_im, (BATCH, N_TOK, VIS_DIM), jnp.float32)

    out = prompt_learner_forward(im_features, w1, b1, w2, b2, ctx, prefix, suffix)
    out = jax.block_until_ready(out)

    ref = prompt_learner_reference(im_features, w1, b1, w2, b2, ctx, prefix, suffix)
    np.testing.assert_allclose(np.asarray(out), np.asarray(ref), rtol=1e-5, atol=1e-5)

    print("KERNEL_OK")
</pallas_src>

<mosaic_0001>
module attributes {stable_mosaic.version = 11 : i64} {
  func.func @prompt_learner_kernel(%arg0: i32, %arg1: memref<16x64xf32, #tpu.memory_space<vmem>>, %arg2: memref<8x16xf32, #tpu.memory_space<vmem>>, %arg3: memref<64x4xf32, #tpu.memory_space<vmem>>, %arg4: memref<1x4xf32, #tpu.memory_space<vmem>>, %arg5: memref<4x2048xf32, #tpu.memory_space<vmem>>, %arg6: memref<8x2048xf32, #tpu.memory_space<vmem>>, %arg7: memref<8x2048xf32, #tpu.memory_space<vmem>>) attributes {dimension_semantics = [#tpu.dimension_semantics<arbitrary>], iteration_bounds = array<i64: 1>, scalar_prefetch = 0 : i64, scratch_operands = 0 : i64, tpu.core_type = #tpu.core_type<tc>, window_params = [{pipeline_mode = #tpu.pipeline_mode<synchronous>, transform_indices = @transform_0, window_bounds = array<i64: 16, 64>}, {pipeline_mode = #tpu.pipeline_mode<synchronous>, transform_indices = @transform_1, window_bounds = array<i64: 8, 16>}, {pipeline_mode = #tpu.pipeline_mode<synchronous>, transform_indices = @transform_2, window_bounds = array<i64: 64, 4>}, {pipeline_mode = #tpu.pipeline_mode<synchronous>, transform_indices = @transform_3, window_bounds = array<i64: 1, 4>}, {pipeline_mode = #tpu.pipeline_mode<synchronous>, transform_indices = @transform_4, window_bounds = array<i64: 4, 2048>}, {pipeline_mode = #tpu.pipeline_mode<synchronous>, transform_indices = @transform_5, window_bounds = array<i64: 8, 2048>}, {pipeline_mode = #tpu.pipeline_mode<synchronous>, transform_indices = @transform_6, window_bounds = array<i64: 8, 2048>}]} {
    %c0 = arith.constant 0 : index
    %c0_0 = arith.constant 0 : index
    %0 = vector.load %arg2[%c0, %c0_0] : memref<8x16xf32, #tpu.memory_space<vmem>>, vector<8x16xf32>
    %c0_1 = arith.constant 0 : index
    %c0_2 = arith.constant 0 : index
    %1 = vector.load %arg1[%c0_1, %c0_2] : memref<16x64xf32, #tpu.memory_space<vmem>>, vector<16x64xf32>
    %cst = arith.constant dense<0.000000e+00> : vector<8x64xf32>
    %2 = tpu.matmul %0, %1, %cst {dimension_numbers = #tpu.dot_dimension_numbers<[1], [0], [0], [1], [0, 0, 1, 1], [], []>} : vector<8x16xf32>, vector<16x64xf32>, vector<8x64xf32> -> vector<8x64xf32>
    %c0_3 = arith.constant 0 : index
    %c0_4 = arith.constant 0 : index
    %3 = vector.load %arg3[%c0_3, %c0_4] : memref<64x4xf32, #tpu.memory_space<vmem>>, vector<64x4xf32>
    %cst_5 = arith.constant dense<0.000000e+00> : vector<8x4xf32>
    %4 = tpu.matmul %2, %3, %cst_5 {dimension_numbers = #tpu.dot_dimension_numbers<[1], [0], [0], [1], [0, 0, 1, 1], [], []>} : vector<8x64xf32>, vector<64x4xf32>, vector<8x4xf32> -> vector<8x4xf32>
    %c0_6 = arith.constant 0 : index
    %c0_7 = arith.constant 0 : index
    %5 = vector.load %arg4[%c0_6, %c0_7] : memref<1x4xf32, #tpu.memory_space<vmem>>, vector<1x4xf32>
    %6 = vector.broadcast %5 : vector<1x4xf32> to vector<8x4xf32>
    %7 = arith.addf %4, %6 : vector<8x4xf32>
    %cst_8 = arith.constant 0.000000e+00 : f32
    %8 = vector.broadcast %cst_8 : f32 to vector<8x4xf32>
    %9 = arith.maximumf %7, %8 : vector<8x4xf32>
    %c0_9 = arith.constant 0 : index
    %c0_10 = arith.constant 0 : index
    %10 = vector.load %arg5[%c0_9, %c0_10] : memref<4x2048xf32, #tpu.memory_space<vmem>>, vector<4x2048xf32>
    %cst_11 = arith.constant dense<0.000000e+00> : vector<8x2048xf32>
    %11 = tpu.matmul %9, %10, %cst_11 {dimension_numbers = #tpu.dot_dimension_numbers<[1], [0], [0], [1], [0, 0, 1, 1], [], []>} : vector<8x4xf32>, vector<4x2048xf32>, vector<8x2048xf32> -> vector<8x2048xf32>
    %c0_12 = arith.constant 0 : index
    %c0_13 = arith.constant 0 : index
    %12 = vector.load %arg6[%c0_12, %c0_13] : memref<8x2048xf32, #tpu.memory_space<vmem>>, vector<8x2048xf32>
    %13 = arith.addf %12, %11 : vector<8x2048xf32>
    %c0_14 = arith.constant 0 : index
    %c0_15 = arith.constant 0 : index
    %14 = vector.load %arg7[%c0_14, %c0_15] : memref<8x2048xf32, #tpu.memory_space<vmem>>, vector<8x2048xf32>
    tpu.vector_store %arg7[%c0_14, %c0_15], %13 {strides = array<i32>} : memref<8x2048xf32, #tpu.memory_space<vmem>>, vector<8x2048xf32>,
    return
  }
  func.func @transform_0(%arg0: i32) -> (i32, i32) {
    %c0_i32 = arith.constant 0 : i32
    %c0_i32_0 = arith.constant 0 : i32
    %c0_i32_1 = arith.constant 0 : i32
    return %c0_i32, %c0_i32_0 : i32, i32
  }
  func.func @transform_1(%arg0: i32) -> (i32, i32) {
    %c0_i32 = arith.constant 0 : i32
    %c0_i32_0 = arith.constant 0 : i32
    %c0_i32_1 = arith.constant 0 : i32
    return %c0_i32, %c0_i32_0 : i32, i32
  }
  func.func @transform_2(%arg0: i32) -> (i32, i32) {
    %c0_i32 = arith.constant 0 : i32
    %c0_i32_0 = arith.constant 0 : i32
    %c0_i32_1 = arith.constant 0 : i32
    return %c0_i32, %c0_i32_0 : i32, i32
  }
  func.func @transform_3(%arg0: i32) -> (i32, i32) {
    %c0_i32 = arith.constant 0 : i32
    %c0_i32_0 = arith.constant 0 : i32
    %c0_i32_1 = arith.constant 0 : i32
    return %c0_i32, %c0_i32_0 : i32, i32
  }
  func.func @transform_4(%arg0: i32) -> (i32, i32) {
    %c0_i32 = arith.constant 0 : i32
    %c0_i32_0 = arith.constant 0 : i32
    %c0_i32_1 = arith.constant 0 : i32
    return %c0_i32, %c0_i32_0 : i32, i32
  }
  func.func @transform_5(%arg0: i32) -> (i32, i32) {
    %c0_i32 = arith.constant 0 : i32
    %c0_i32_0 = arith.constant 0 : i32
    %c0_i32_1 = arith.constant 0 : i32
    return %c0_i32, %c0_i32_0 : i32, i32
  }
  func.func @transform_6(%arg0: i32) -> (i32, i32) {
    %c0_i32 = arith.constant 0 : i32
    %c0_i32_0 = arith.constant 0 : i32
    %c0_i32_1 = arith.constant 0 : i32
    return %c0_i32, %c0_i32_0 : i32, i32
  }
}

</mosaic_0001>

<bundles_post_ra>
// kernel: tpu_custom_call.1
= control target key start
LH: loop header
LB: loop body
LE: loop exit
PB: predicated region body
PF: predicated region fallthrough
CT: control target
= control target key end

     0   :  { %11 = vsyncpa [#allocation3], 0  ;;  %s1242_s0 = inlined_call_operand.vmem [shape: f32[16,64], index: 0, kind: input, shape index: {}]   ;;  %s1243_s1 = inlined_call_operand.hbm [shape: f32[8,16], index: 1, kind: input, shape index: {}]   ;;  %s1244_s2 = inlined_call_operand.vmem [shape: f32[64,4], index: 2, kind: input, shape index: {}]   ;;  %s1245_s3 = inlined_call_operand.vmem [shape: f32[1,4], index: 3, kind: input, shape index: {}]   ;;  %s1246_s4 = inlined_call_operand.vmem [shape: f32[4,2048], index: 4, kind: input, shape index: {}]   ;;  %s1247_s5 = inlined_call_operand.hbm [shape: f32[8,2048], index: 5, kind: input, shape index: {}]   ;;  %s1248_s6 = inlined_call_operand.hbm [shape: f32[8,2048], index: 6, kind: output, shape index: {}]  }
   0x1   :  { %12 = vsyncpa [#allocation6], 0 }
   0x2   :  { %13 = vsyncpa [#allocation4], 0  ;;  %s1074_s21 = smov [#allocation2]   ;;  %s1075_s23 = smov [#allocation5]  }
   0x3   :  { %s22_s22 = sshll.u32 %s1074_s21, 4  ;;  %s38_s24 = sshll.u32 %s1075_s23, 4  ;;  %s23_s22 = int_to_ptr.vmem [resolvable:$true] %s22_s22  ;;  %s39_s24 = int_to_ptr.vmem [resolvable:$true] %s38_s24 }
   0x4   :  { %s1002_s27 = scalar_lea.hbm %s1243_s1, 128 }
   0x5   :  { %p1003_p0 = scmp.ne.s32.totalorder %s1243_s1, %s1002_s27  ;;  %p1006_p1 = scmp.lt.u32.totalorder %s1002_s27, %s1243_s1 }
   0x7   :  { %p1008_p2 = pnand %p1006_p1, %p1003_p0 }
   0x9   :  { %1011 = shalt.err (!%p1008_p2)
}
   0xa   :  { %s1012_s8 = scalar_lea.vmem %s23_s22, 128  ;;  %p1017_p4 = scmp.lt.s32.totalorder %s23_s22, %s23_s22 }
   0xb   :  { %p1013_p3 = scmp.ne.s32.totalorder %s23_s22, %s1012_s8  ;;  %p1018_p5 = scmp.lt.s32.totalorder %s1012_s8, %s1012_s8 }
   0xd   :  { %p1019_p6 = por %p1018_p5, %p1017_p4 }
   0xf   :  { %p1020_p7 = pnand %p1019_p6, %p1013_p3 }
  0x11   :  { %1023 = shalt.err (!%p1020_p7)
}
  0x12   :  { %25 = dma.hbm_to_vmem [thread:$0]  %s1243_s1, 128, %s23_s22, [#allocation3]  }
  0x13   :  { %s1024_s13 = scalar_lea.hbm %s1247_s5, 2048 }
  0x14   :  { %p1025_p8 = scmp.ne.s32.totalorder %s1247_s5, %s1024_s13  ;;  %p1028_p9 = scmp.lt.u32.totalorder %s1024_s13, %s1247_s5 }
  0x16   :  { %p1030_p10 = pnand %p1028_p9, %p1025_p8 }
  0x18   :  { %1033 = shalt.err (!%p1030_p10)
}
  0x19   :  { %s1034_s18 = scalar_lea.vmem %s39_s24, 2048  ;;  %p1039_p12 = scmp.lt.s32.totalorder %s39_s24, %s39_s24 }
  0x1a   :  { %p1035_p11 = scmp.ne.s32.totalorder %s39_s24, %s1034_s18  ;;  %p1040_p13 = scmp.lt.s32.totalorder %s1034_s18, %s1034_s18 }
  0x1c   :  { %p1041_p0 = por %p1040_p13, %p1039_p12 }
  0x1e   :  { %p1042_p1 = pnand %p1041_p0, %p1035_p11 }
  0x20   :  { %1045 = shalt.err (!%p1042_p1)
}
  0x21   :  { %41 = dma.hbm_to_vmem [thread:$0]  %s1247_s5, 2048, %s39_s24, [#allocation6]  }
  0x22   :  { %1068 = dma.done.wait [#allocation3], 128  }
  0x23   :  { %1069 = vsyncadd [#allocation3], 4294967168 }
  0x24   :  { %1070 = dma.done.wait [#allocation6], 2048  }
  0x25   :  { %1071 = vsyncadd [#allocation6], 4294965248  ;;  %v1076_v0 = vmov 0.0|0.0   ;;  %vm1077_vm0 = vmmov 0   ;;  %v1078_v1 = vmov 0.0   ;;  %v49_v2 = vld [vmem:[%s1242_s0] sm:$0xff] }
  0x26   :  { %973 = vmatprep.subr.bf16.mxu0 %v1076_v0  ;;  %951 = vmatprep.mubr.msk.f32.mxu0 %vm1077_vm0, %v1078_v1  ;;  %v50_v3 = vld [vmem:[%s1242_s0 + $0x8] sm:$0xff]  ;;  %v125_v5 = vld [vmem:[%s1244_s2] sm:$0xff]  ;;  %v127_v7 = vld [vmem:[%s1244_s2 + $0x10] sm:$0xff]  ;;  %vm51_vm1 = vcmask 130048   ;;  %vm140_vm2 = vcmask 523264   ;;  %vm243_vm3 = vcmask 1043456  }
  0x27   :  { %976 = vmatprep.subr.bf16.mxu1 %v1076_v0  ;;  %970 = vmatprep.mubr.msk.f32.mxu1 %vm1077_vm0, %v1078_v1  ;;  %v974_v4 = vpack.c.bf16 %v50_v3, %v49_v2  ;;  %v126_v6 = vld [vmem:[%s1244_s2 + $0x8] sm:$0xff]  ;;  %v128_v9 = vld [vmem:[%s1244_s2 + $0x18] sm:$0xff]  ;;  %v48_v10 = vld [vmem:[#allocation2] sm:$0xff]  ;;  %vm239_vm4 = vcmask 31744  }
  0x28   :  { %v977_v8 = vpack.c.bf16 %v126_v6, %v125_v5  ;;  %v980_v11 = vpack.c.bf16 %v128_v9, %v127_v7  ;;  %v129_v12 = vld [vmem:[%s1244_s2 + $0x20] sm:$0xff]  ;;  %v130_v13 = vld [vmem:[%s1244_s2 + $0x28] sm:$0xff]  ;;  %v131_v15 = vld [vmem:[%s1244_s2 + $0x30] sm:$0xff] }
  0x29   :  { %975 = vmatpush3.bf16.msra.mxu0 %v974_v4  ;;  %v983_v14 = vpack.c.bf16 %v130_v13, %v129_v12  ;;  %v132_v16 = vld [vmem:[%s1244_s2 + $0x38] sm:$0xff]  ;;  %v215_v20 = vld [vmem:[%s1246_s4] sm:$0xff]  ;;  %v216_v24 = vld [vmem:[%s1246_s4 + $0x8] sm:$0xff] }
  0x2a   :  { %978 = vmatpush3.bf16.msra.mxu1 %v977_v8  ;;  %v986_v17 = vpack.c.bf16 %v132_v16, %v131_v15  ;;  %v219_v21 = vld [vmem:[%s1246_s4 + $0x20] sm:$0xff]  ;;  %v231_v22 = vcombine.high %v215_v20, %v215_v20  ;;  %v232_v25 = vcombine.high %v216_v24, %v216_v24  ;;  %v221_v26 = vld [vmem:[%s1246_s4 + $0x30] sm:$0xff]  ;;  %v218_v35 = vld [vmem:[%s1246_s4 + $0x18] sm:$0xff] }
  0x2b   :  { %979 = vmatprep.subr.bf16.mxu1 %v1076_v0  ;;  %v235_v23 = vcombine.high %v219_v21, %v219_v21  ;;  %v237_v27 = vcombine.high %v221_v26, %v221_v26  ;;  %v909_v28 = vld [vmem:[%s1245_s3] ss:$0 sm:$0xff]  ;;  %v217_v30 = vld [vmem:[%s1246_s4 + $0x10] sm:$0xff]  ;;  %v234_v36 = vcombine.high %v218_v35, %v218_v35  ;;  %v220_v37 = vld [vmem:[%s1246_s4 + $0x28] sm:$0xff] }
  0x2c   :  { %952 = vmatmul.mubr.msk.f32.vlgmr.msra.gmra.mrb[0].mxu0 %vm51_vm1, %v48_v10  ;;  %911 = vmatprep.subr.msk.mxu0 %vm243_vm3, %v231_v22  ;;  %v233_v34 = vcombine.high %v217_v30, %v217_v30  ;;  %v236_v38 = vcombine.high %v220_v37, %v220_v37  ;;  %v222_v39 = vld [vmem:[%s1246_s4 + $0x38] sm:$0xff]  ;;  %v844_v41 = vld [vmem:[#allocation5] sm:$0xff]  ;;  %v845_v43 = vld [vmem:[#allocation5 + $0x8] sm:$0xff]  ;;  %s1079_s4 = smov [#allocation7]  }
  0x2d   :  { %340 = vmatprep.mubr.f32.mxu0 %v1078_v1  ;;  %912 = vmatpush1.msk.msra.mxu0 %vm243_vm3, %v215_v20  ;;  %v238_v40 = vcombine.high %v222_v39, %v222_v39  ;;  %v852_v42 = vld [vmem:[#allocation5 + $0x40] sm:$0xff]  ;;  %v853_v44 = vld [vmem:[#allocation5 + $0x48] sm:$0xff]  ;;  %v846_v53 = vld [vmem:[#allocation5 + $0x10] sm:$0xff]  ;;  %s898_s28 = sshll.u32 %s1079_s4, 4  ;;  %s899_s28 = int_to_ptr.vmem [resolvable:$true] %s898_s28 }
  0x2e   :  { %981 = vmatpush3.bf16.msra.mxu1 %v980_v11  ;;  %914 = vmatprep.subr.msk.mxu0 %vm243_vm3, %v232_v25  ;;  %v856_v54 = vld [vmem:[#allocation5 + $0x60] sm:$0xff]  ;;  %v847_v55 = vld [vmem:[#allocation5 + $0x18] sm:$0xff]  ;;  %v857_v56 = vld [vmem:[#allocation5 + $0x68] sm:$0xff]  ;;  %s1046_s29 = scalar_lea.vmem %s899_s28, 2048  ;;  %p1051_p3 = scmp.lt.s32.totalorder %s899_s28, %s899_s28 }
  0x2f   :  { %982 = vmatprep.subr.bf16.mxu1 %v1076_v0  ;;  %v849_v2 = vld [vmem:[#allocation5 + $0x28] sm:$0xff]  ;;  %v850_v7 = vld [vmem:[#allocation5 + $0x30] sm:$0xff]  ;;  %v851_v8 = vld [vmem:[#allocation5 + $0x38] sm:$0xff]  ;;  %p1047_p2 = scmp.ne.s32.totalorder %s899_s28, %s1046_s29  ;;  %p1052_p4 = scmp.lt.s32.totalorder %s1046_s29, %s1046_s29 }
  0x30   :  { %v854_v13 = vld [vmem:[#allocation5 + $0x50] sm:$0xff]  ;;  %v859_v20 = vld [vmem:[#allocation5 + $0x78] sm:$0xff] }
  0x31   :  { %p1053_p5 = por %p1052_p4, %p1051_p3 }
  0x32   :  { %984 = vmatpush3.bf16.msra.mxu1 %v983_v14  ;;  %v855_v14 = vld [vmem:[#allocation5 + $0x58] sm:$0xff] }
  0x33   :  { %985 = vmatprep.subr.bf16.mxu1 %v1076_v0  ;;  %p1054_p6 = pnand %p1053_p5, %p1047_p2 }
  0x36   :  { %987 = vmatpush3.bf16.msra.mxu1 %v986_v17 }
  0x37   :  { %923 = vmatprep.subr.msk.mxu1 %vm243_vm3, %v235_v23 }
  0xff   :  { %v121_v18 = vpop.f32.mrb[0].mxu0 }
 0x100   :  { %v953_v19 = vpop.f32.mrb[1].mxu0  ;;  %971 = vmatmul.mubr.msk.f32.vlgmr.msra.gmra.mrb[0].mxu1 %vm140_vm2, %v121_v18 }
 0x101   :  { %624 = vmatprep.mubr.f32.mxu1 %v1078_v1  ;;  %924 = vmatpush1.msk.msra.mxu1 %vm243_vm3, %v219_v21  ;;  %v858_v19 = vld [vmem:[#allocation5 + $0x70] sm:$0xff] }
 0x102   :  { %929 = vmatprep.subr.msk.mxu1 %vm243_vm3, %v237_v27 }
 0x1d3   :  { %v210_v29 = vpop.f32.mrb[0].mxu1 }
 0x1d4   :  { %v211_v31 = vadd.f32 %v909_v28, %v210_v29  ;;  %v972_v32 = vpop.f32.mrb[1].mxu1 }
 0x1d6   :  { %v214_v33 = vmax.f32 %v211_v31, 0.0 }
 0x1d8   :  { %913 = vmatmul.mubr.msk.f32.vlgmr.msra.gmra.mrb[2].mxu0 %vm239_vm4, %v214_v33  ;;  %925 = vmatmul.mubr.msk.f32.vlgmr.msra.gmra.mrb[2].mxu1 %vm239_vm4, %v214_v33 }
 0x1d9   :  { %915 = vmatpush1.msk.msra.mxu0 %vm243_vm3, %v216_v24  ;;  %411 = vmatprep.mubr.f32.mxu0 %v1078_v1 }
 0x1da   :  { %917 = vmatprep.subr.msk.mxu0 %vm243_vm3, %v233_v34  ;;  %930 = vmatpush1.msk.msra.mxu1 %vm243_vm3, %v221_v26 }
 0x1db   :  { %766 = vmatprep.mubr.f32.mxu1 %v1078_v1 }
 0x1dc   :  { %916 = vmatmul.mubr.msk.f32.vlgmr.msra.gmra.mrb[4].mxu0 %vm239_vm4, %v214_v33  ;;  %931 = vmatmul.mubr.msk.f32.vlgmr.msra.gmra.mrb[4].mxu1 %vm239_vm4, %v214_v33 }
 0x1dd   :  { %918 = vmatpush1.msk.msra.mxu0 %vm243_vm3, %v217_v30  ;;  %482 = vmatprep.mubr.f32.mxu0 %v1078_v1 }
 0x1de   :  { %920 = vmatprep.subr.msk.mxu0 %vm243_vm3, %v234_v36 }
 0x1e0   :  { %919 = vmatmul.mubr.msk.f32.vlgmr.msra.gmra.mrb[6].mxu0 %vm239_vm4, %v214_v33 }
 0x1e1   :  { %921 = vmatpush1.msk.msra.mxu0 %vm243_vm3, %v218_v35  ;;  %553 = vmatprep.mubr.f32.mxu0 %v1078_v1 }
 0x1e2   :  { %926 = vmatprep.subr.msk.mxu0 %vm243_vm3, %v236_v38 }
 0x1e4   :  { %922 = vmatmul.mubr.msk.f32.vlgmr.msra.gmra.mrb[8].mxu0 %vm239_vm4, %v214_v33 }
 0x1e5   :  { %927 = vmatpush1.msk.msra.mxu0 %vm243_vm3, %v220_v37  ;;  %695 = vmatprep.mubr.f32.mxu0 %v1078_v1 }
 0x1e6   :  { %932 = vmatprep.subr.msk.mxu0 %vm243_vm3, %v238_v40 }
 0x1e8   :  { %928 = vmatmul.mubr.msk.f32.vlgmr.msra.gmra.mrb[10].mxu0 %vm239_vm4, %v214_v33 }
 0x1e9   :  { %933 = vmatpush1.msk.msra.mxu0 %vm243_vm3, %v222_v39  ;;  %837 = vmatprep.mubr.f32.mxu0 %v1078_v1  ;;  %v848_v1 = vld [vmem:[#allocation5 + $0x20] sm:$0xff] }
 0x1ec   :  { %934 = vmatmul.mubr.msk.f32.vlgmr.msra.gmra.mrb[12].mxu0 %vm239_vm4, %v214_v33 }
 0x2ab   :  { %v342_v45 = vpop.f32.mrb[2].mxu0  ;;  %v626_v46 = vpop.f32.mrb[2].mxu1 }
 0x2ac   :  { %v860_v47 = vadd.f32 %v844_v41, %v342_v45  ;;  %v868_v48 = vadd.f32 %v852_v42, %v626_v46  ;;  %v344_v49 = vpop.f32.mrb[3].mxu0  ;;  %v628_v50 = vpop.f32.mrb[3].mxu1 }
 0x2ad   :  { %v861_v51 = vadd.f32 %v845_v43, %v344_v49  ;;  %v869_v52 = vadd.f32 %v853_v44, %v628_v50 }
 0x2ae   :  { %876 = vst [vmem:[#allocation7] sm:$0xff] %v860_v47  ;;  %884 = vst [vmem:[#allocation7 + $0x40] sm:$0xff] %v868_v48 }
 0x2af   :  { %877 = vst [vmem:[#allocation7 + $0x8] sm:$0xff] %v861_v51  ;;  %885 = vst [vmem:[#allocation7 + $0x48] sm:$0xff] %v869_v52  ;;  %v413_v57 = vpop.f32.mrb[4].mxu0  ;;  %v768_v58 = vpop.f32.mrb[4].mxu1 }
 0x2b0   :  { %v862_v59 = vadd.f32 %v846_v53, %v413_v57  ;;  %v872_v60 = vadd.f32 %v856_v54, %v768_v58  ;;  %v415_v61 = vpop.f32.mrb[5].mxu0  ;;  %v770_v62 = vpop.f32.mrb[5].mxu1 }
 0x2b1   :  { %v863_v63 = vadd.f32 %v847_v55, %v415_v61  ;;  %v873_v0 = vadd.f32 %v857_v56, %v770_v62 }
 0x2b2   :  { %878 = vst [vmem:[#allocation7 + $0x10] sm:$0xff] %v862_v59  ;;  %888 = vst [vmem:[#allocation7 + $0x60] sm:$0xff] %v872_v60 }
 0x2b3   :  { %879 = vst [vmem:[#allocation7 + $0x18] sm:$0xff] %v863_v63  ;;  %889 = vst [vmem:[#allocation7 + $0x68] sm:$0xff] %v873_v0  ;;  %v484_v3 = vpop.f32.mrb[6].mxu0 }
 0x2b4   :  { %v864_v4 = vadd.f32 %v848_v1, %v484_v3  ;;  %v486_v5 = vpop.f32.mrb[7].mxu0 }
 0x2b5   :  { %v865_v6 = vadd.f32 %v849_v2, %v486_v5 }
 0x2b6   :  { %880 = vst [vmem:[#allocation7 + $0x20] sm:$0xff] %v864_v4 }
 0x2b7   :  { %881 = vst [vmem:[#allocation7 + $0x28] sm:$0xff] %v865_v6  ;;  %v555_v9 = vpop.f32.mrb[8].mxu0 }
 0x2b8   :  { %v866_v10 = vadd.f32 %v850_v7, %v555_v9  ;;  %v557_v11 = vpop.f32.mrb[9].mxu0 }
 0x2b9   :  { %v867_v12 = vadd.f32 %v851_v8, %v557_v11 }
 0x2ba   :  { %882 = vst [vmem:[#allocation7 + $0x30] sm:$0xff] %v866_v10 }
 0x2bb   :  { %883 = vst [vmem:[#allocation7 + $0x38] sm:$0xff] %v867_v12  ;;  %v697_v15 = vpop.f32.mrb[10].mxu0 }
 0x2bc   :  { %v870_v16 = vadd.f32 %v854_v13, %v697_v15  ;;  %v699_v17 = vpop.f32.mrb[11].mxu0 }
 0x2bd   :  { %v871_v18 = vadd.f32 %v855_v14, %v699_v17 }
 0x2be   :  { %886 = vst [vmem:[#allocation7 + $0x50] sm:$0xff] %v870_v16 }
 0x2bf   :  { %887 = vst [vmem:[#allocation7 + $0x58] sm:$0xff] %v871_v18  ;;  %v839_v21 = vpop.f32.mrb[12].mxu0 }
 0x2c0   :  { %v874_v22 = vadd.f32 %v858_v19, %v839_v21  ;;  %v841_v23 = vpop.f32.mrb[13].mxu0 }
 0x2c1   :  { %v875_v24 = vadd.f32 %v859_v20, %v841_v23 }
 0x2c2   :  { %890 = vst [vmem:[#allocation7 + $0x70] sm:$0xff] %v874_v22 }
 0x2c3   :  { %891 = vst [vmem:[#allocation7 + $0x78] sm:$0xff] %v875_v24 }
 0x2c4   :  { %1057 = shalt.err (!%p1054_p6)
}
 0x2c5   :  { %s1058_s7 = scalar_lea.hbm %s1248_s6, 2048 }
 0x2c6   :  { %p1059_p7 = scmp.ne.s32.totalorder %s1248_s6, %s1058_s7  ;;  %p1062_p8 = scmp.lt.u32.totalorder %s1058_s7, %s1248_s6 }
 0x2c8   :  { %p1064_p9 = pnand %p1062_p8, %p1059_p7 }
 0x2ca   :  { %1067 = shalt.err (!%p1064_p9)
}
 0x2cb   :  { %901 = dma.vmem_to_hbm [thread:$0]  %s899_s28, 2048, %s1248_s6, [#allocation4]  }
 0x2cc   :  { %1072 = dma.done.wait [#allocation4], 2048  }
 0x2cd   :  { %1073 = vsyncadd [#allocation4], 4294965248 }
 0x2ce   :  { %905 = vsyncpa [#allocation3], 1 }
 0x2cf   :  { %906 = vsyncpa [#allocation6], 1 }
 0x2d0   :  { %907 = vsyncpa [#allocation4], 1 }

</bundles_post_ra>
